<compile_context>
chip_gen: v7x
topology: tpu7x:2x2x1
jax: 0.10.0
libtpu: 0.0.40
codegen_flags: <defaults>
</compile_context>

<pallas_src>
import functools

import jax
import jax.numpy as jnp
from jax.experimental import pallas as pl
from jax.experimental.pallas import tpu as pltpu  # noqa: F401

# KarateClub: 34 nodes, 34 (identity) features, 4 classes; GCNConv hidden = 3
N_NODES = 34
N_FEATS = 34
HIDDEN = 3
N_CLASSES = 4

# Padded tile sizes.
#   N_P   = 64  : node dim inside the kernel (adjacency rows/cols, X rows)
#   F_PAD = 64  : feature lanes (X cols == W1 rows)
#   H_PAD = 128 : hidden lanes (lane-dense)
#   C_PAD = 128 : class lanes  (lane-dense)
#   N_OUT = 40  : output rows (>= 34, multiple of 8) — trims writeback DMA
N_P = 64
F_PAD = 64
H_PAD = 128
C_PAD = 128
N_OUT = 40


def _gnn_kernel(edges_ref, x_ref, w1_ref, b1_ref, w2_ref, b2_ref, out_ref,
                *, n_nodes):
    n_p = x_ref.shape[0]
    e_pad = edges_ref.shape[1]

    # ---- adjacency build (fused; replaces XLA scatter + eye + pad fusions) ----
    # One-hot of src/dst via iota compares; padded edges hold -1 => all-zero columns.
    node_id = jax.lax.broadcasted_iota(jnp.int32, (n_p, e_pad), 0)
    src = edges_ref[0:1, :]                                    # (1, E_PAD)
    dst = edges_ref[1:2, :]                                    # (1, E_PAD)
    s_oh = (node_id == src).astype(jnp.float32)                # (N_P, E_PAD)
    d_oh = (node_id == dst).astype(jnp.float32)                # (N_P, E_PAD)
    # A[i, j] = #edges (src=i, dst=j): MXU matmul contracting the edge axis
    # (duplicate edges accumulate, matching scatter-add / PyG message passing).
    a = jax.lax.dot_general(s_oh, d_oh, (((1,), (1,)), ((), ())),
                            preferred_element_type=jnp.float32)  # (N_P, N_P)
    # + self loops on real nodes only
    ri = jax.lax.broadcasted_iota(jnp.int32, (n_p, n_p), 0)
    ci = jax.lax.broadcasted_iota(jnp.int32, (n_p, n_p), 1)
    a = a + jnp.where((ri == ci) & (ri < n_nodes), 1.0, 0.0)

    # ---- symmetric normalization, factored to avoid materializing A_norm ----
    # h = D^-1/2 (A+I) D^-1/2 (X W1) + b1  ==  d ⊙ (A @ (d ⊙ (X W1))) + b1
    deg = jnp.sum(a, axis=1, keepdims=True)                    # (N_P, 1)  XLU
    dinv = jnp.where(deg > 0.0, jax.lax.rsqrt(deg), 0.0)       # EUP; padded rows -> 0

    xw = jnp.dot(x_ref[...], w1_ref[...], preferred_element_type=jnp.float32)
    h = dinv * jnp.dot(a, dinv * xw, preferred_element_type=jnp.float32) + b1_ref[...]

    # embedding = relu(h): VMEM temporary only (writing it back would be redundant DMA)
    emb = jnp.maximum(h, 0.0)
    z = jnp.dot(emb, w2_ref[...], preferred_element_type=jnp.float32) + b2_ref[...]

    # single lane-dense (N_OUT, 256) store: h in lanes [0,128), z in lanes [128,256)
    n_out = out_ref.shape[0]
    out_ref[...] = jnp.concatenate([h[:n_out, :], z[:n_out, :]], axis=1)


def _pad2d(m, shape):
    out = jnp.zeros(shape, jnp.float32)
    return out.at[: m.shape[0], : m.shape[1]].set(m.astype(jnp.float32))


def _full_spec(shape):
    # single-block kernel (grid=()): each operand is one full-array block
    return pl.BlockSpec(shape, lambda: tuple(0 for _ in shape))


def make_gnn_forward(w1, b1, w2, b2):
    """Pads the (fixed) parameters once and returns a jitted forward(x, edge_index)."""
    w1_p = jax.device_put(_pad2d(w1, (F_PAD, H_PAD)))
    b1_p = jax.device_put(_pad2d(b1[None, :], (1, H_PAD)))
    w2_p = jax.device_put(_pad2d(w2, (H_PAD, C_PAD)))
    b2_p = jax.device_put(_pad2d(b2[None, :], (1, C_PAD)))

    @jax.jit
    def forward(x, edge_index):
        n, f = x.shape
        e = edge_index.shape[1]
        e_pad = max(128, pl.cdiv(e, 128) * 128)

        # Only per-call inputs are padded here (two tiny fusions total).
        edges_p = jnp.full((2, e_pad), -1, jnp.int32).at[:, :e].set(
            edge_index.astype(jnp.int32))
        x_p = jnp.zeros((N_P, F_PAD), jnp.float32).at[:n, :f].set(
            x.astype(jnp.float32))

        cost = pl.CostEstimate(
            flops=2 * (N_P * e_pad * N_P          # one-hot adjacency matmul
                       + N_P * F_PAD * H_PAD      # X @ W1
                       + N_P * N_P * H_PAD        # A @ (d * XW)
                       + N_P * H_PAD * C_PAD),    # emb @ W2
            transcendentals=N_P,                  # rsqrt per node row
            bytes_accessed=4 * (2 * e_pad + N_P * F_PAD + F_PAD * H_PAD + H_PAD
                                + H_PAD * C_PAD + C_PAD
                                + N_OUT * (H_PAD + C_PAD)),
        )

        out = pl.pallas_call(
            functools.partial(_gnn_kernel, n_nodes=n),
            grid=(),
            in_specs=[
                _full_spec((2, e_pad)),
                _full_spec((N_P, F_PAD)),
                _full_spec((F_PAD, H_PAD)),
                _full_spec((1, H_PAD)),
                _full_spec((H_PAD, C_PAD)),
                _full_spec((1, C_PAD)),
            ],
            out_specs=_full_spec((N_OUT, H_PAD + C_PAD)),
            out_shape=jax.ShapeDtypeStruct((N_OUT, H_PAD + C_PAD), jnp.float32),
            cost_estimate=cost,
        )(edges_p, x_p, w1_p, b1_p, w2_p, b2_p)

        h = out[:n, :HIDDEN]
        emb = jnp.maximum(h, 0.0)   # relu on the 34x3 slice; exact, negligible
        z = out[:n, H_PAD:H_PAD + N_CLASSES]
        return h, emb, z

    return forward


if __name__ == "__main__":
    key = jax.random.PRNGKey(0)
    k1, k2, k3, k4, k5 = jax.random.split(key, 5)

    # Deterministic synthetic undirected graph on 34 nodes:
    # a ring plus 10 random chords (each stored in both directions).
    nodes = jnp.arange(N_NODES)
    ring_src = jnp.concatenate([nodes, (nodes + 1) % N_NODES])
    ring_dst = jnp.concatenate([(nodes + 1) % N_NODES, nodes])
    extra = jax.random.randint(k5, (2, 10), 0, N_NODES)
    src = jnp.concatenate([ring_src, extra[0], extra[1]])
    dst = jnp.concatenate([ring_dst, extra[1], extra[0]])
    edge_index = jnp.stack([src, dst]).astype(jnp.int32)  # [2, 88]

    # KarateClub node features are one-hot (identity) of size 34.
    x = jnp.eye(N_NODES, N_FEATS, dtype=jnp.float32)

    # Deterministic parameter init (shapes from GCNConv(34,3) and Linear(3,4)).
    w1 = 0.1 * jax.random.normal(k1, (N_FEATS, HIDDEN), jnp.float32)
    b1 = 0.1 * jax.random.normal(k2, (HIDDEN,), jnp.float32)
    w2 = 0.1 * jax.random.normal(k3, (HIDDEN, N_CLASSES), jnp.float32)
    b2 = 0.1 * jax.random.normal(k4, (N_CLASSES,), jnp.float32)

    gnn_forward = make_gnn_forward(w1, b1, w2, b2)
    h, embedding, z = gnn_forward(x, edge_index)
    jax.block_until_ready((h, embedding, z))

    assert h.shape == (N_NODES, HIDDEN)
    assert embedding.shape == (N_NODES, HIDDEN)
    assert z.shape == (N_NODES, N_CLASSES)

    # Pure-JAX reference check (same math, no Pallas).
    a_ref = jnp.zeros((N_NODES, N_NODES), jnp.float32).at[src, dst].add(1.0)
    a_ref = a_ref + jnp.eye(N_NODES, dtype=jnp.float32)
    dis = jax.lax.rsqrt(a_ref.sum(axis=1))
    a_norm = dis[:, None] * a_ref * dis[None, :]
    h_ref = a_norm @ (x @ w1) + b1
    z_ref = jnp.maximum(h_ref, 0.0) @ w2 + b2
    assert jnp.allclose(h, h_ref, rtol=1e-4, atol=1e-4)
    assert jnp.allclose(embedding, jnp.maximum(h_ref, 0.0), rtol=1e-4, atol=1e-4)
    assert jnp.allclose(z, z_ref, rtol=1e-4, atol=1e-4)

    print("KERNEL_OK")
</pallas_src>

<mosaic_0001>
module attributes {stable_mosaic.version = 11 : i64} {
  func.func @_gnn_kernel(%arg0: memref<2x128xi32, #tpu.memory_space<vmem>>, %arg1: memref<64x64xf32, #tpu.memory_space<vmem>>, %arg2: memref<64x128xf32, #tpu.memory_space<vmem>>, %arg3: memref<1x128xf32, #tpu.memory_space<vmem>>, %arg4: memref<128x128xf32, #tpu.memory_space<vmem>>, %arg5: memref<1x128xf32, #tpu.memory_space<vmem>>, %arg6: memref<40x256xf32, #tpu.memory_space<vmem>>) attributes {dimension_semantics = [], scalar_prefetch = 0 : i64, scratch_operands = 0 : i64, tpu.core_type = #tpu.core_type<tc>} {
    %0 = tpu.iota {dimensions = array<i32: 0>} : vector<64x128xi32>
    %c0 = arith.constant 0 : index
    %c0_0 = arith.constant 0 : index
    %1 = vector.load %arg0[%c0, %c0_0] : memref<2x128xi32, #tpu.memory_space<vmem>>, vector<1x128xi32>
    %c1 = arith.constant 1 : index
    %c0_1 = arith.constant 0 : index
    %2 = vector.load %arg0[%c1, %c0_1] : memref<2x128xi32, #tpu.memory_space<vmem>>, vector<1x128xi32>
    %3 = vector.broadcast %1 : vector<1x128xi32> to vector<64x128xi32>
    %4 = arith.cmpi eq, %0, %3 : vector<64x128xi32>
    %5 = arith.extui %4 : vector<64x128xi1> to vector<64x128xi32>
    %6 = arith.sitofp %5 : vector<64x128xi32> to vector<64x128xf32>
    %7 = vector.broadcast %2 : vector<1x128xi32> to vector<64x128xi32>
    %8 = arith.cmpi eq, %0, %7 : vector<64x128xi32>
    %9 = arith.extui %8 : vector<64x128xi1> to vector<64x128xi32>
    %10 = arith.sitofp %9 : vector<64x128xi32> to vector<64x128xf32>
    %cst = arith.constant dense<0.000000e+00> : vector<64x64xf32>
    %11 = tpu.matmul %6, %10, %cst {dimension_numbers = #tpu.dot_dimension_numbers<[1], [1], [0], [0], [0, 0, 1, 0], [], []>} : vector<64x128xf32>, vector<64x128xf32>, vector<64x64xf32> -> vector<64x64xf32>
    %12 = tpu.iota {dimensions = array<i32: 0>} : vector<64x64xi32>
    %13 = tpu.iota {dimensions = array<i32: 1>} : vector<64x64xi32>
    %14 = arith.cmpi eq, %12, %13 : vector<64x64xi32>
    %c34_i32 = arith.constant 34 : i32
    %15 = vector.broadcast %c34_i32 : i32 to vector<64x64xi32>
    %16 = arith.cmpi slt, %12, %15 : vector<64x64xi32>
    %17 = arith.andi %14, %16 : vector<64x64xi1>
    %cst_2 = arith.constant 1.000000e+00 : f32
    %cst_3 = arith.constant 0.000000e+00 : f32
    %18 = vector.broadcast %cst_2 : f32 to vector<64x64xf32>
    %19 = vector.broadcast %cst_3 : f32 to vector<64x64xf32>
    %20 = arith.select %17, %18, %19 : vector<64x64xi1>, vector<64x64xf32>
    %21 = arith.addf %11, %20 : vector<64x64xf32>
    %cst_4 = arith.constant dense<0.000000e+00> : vector<64xf32>
    %22 = vector.multi_reduction <add>, %21, %cst_4 [1] : vector<64x64xf32> to vector<64xf32>
    %23 = vector.shape_cast %22 : vector<64xf32> to vector<64x1xf32>
    %cst_5 = arith.constant 0.000000e+00 : f32
    %24 = vector.broadcast %cst_5 : f32 to vector<64x1xf32>
    %25 = arith.cmpf ogt, %23, %24 : vector<64x1xf32>
    %26 = math.rsqrt %23 : vector<64x1xf32>
    %cst_6 = arith.constant 0.000000e+00 : f32
    %27 = vector.broadcast %cst_6 : f32 to vector<64x1xf32>
    %28 = arith.select %25, %26, %27 : vector<64x1xi1>, vector<64x1xf32>
    %c0_7 = arith.constant 0 : index
    %c0_8 = arith.constant 0 : index
    %29 = vector.load %arg1[%c0_7, %c0_8] : memref<64x64xf32, #tpu.memory_space<vmem>>, vector<64x64xf32>
    %c0_9 = arith.constant 0 : index
    %c0_10 = arith.constant 0 : index
    %30 = vector.load %arg2[%c0_9, %c0_10] : memref<64x128xf32, #tpu.memory_space<vmem>>, vector<64x128xf32>
    %cst_11 = arith.constant dense<0.000000e+00> : vector<64x128xf32>
    %31 = tpu.matmul %29, %30, %cst_11 {dimension_numbers = #tpu.dot_dimension_numbers<[1], [0], [0], [1], [0, 0, 1, 1], [], []>} : vector<64x64xf32>, vector<64x128xf32>, vector<64x128xf32> -> vector<64x128xf32>
    %32 = vector.broadcast %28 : vector<64x1xf32> to vector<64x128xf32>
    %33 = arith.mulf %32, %31 : vector<64x128xf32>
    %cst_12 = arith.constant dense<0.000000e+00> : vector<64x128xf32>
    %34 = tpu.matmul %21, %33, %cst_12 {dimension_numbers = #tpu.dot_dimension_numbers<[1], [0], [0], [1], [0, 0, 1, 1], [], []>} : vector<64x64xf32>, vector<64x128xf32>, vector<64x128xf32> -> vector<64x128xf32>
    %35 = vector.broadcast %28 : vector<64x1xf32> to vector<64x128xf32>
    %36 = arith.mulf %35, %34 : vector<64x128xf32>
    %c0_13 = arith.constant 0 : index
    %c0_14 = arith.constant 0 : index
    %37 = vector.load %arg3[%c0_13, %c0_14] : memref<1x128xf32, #tpu.memory_space<vmem>>, vector<1x128xf32>
    %38 = vector.broadcast %37 : vector<1x128xf32> to vector<64x128xf32>
    %39 = arith.addf %36, %38 : vector<64x128xf32>
    %cst_15 = arith.constant 0.000000e+00 : f32
    %40 = vector.broadcast %cst_15 : f32 to vector<64x128xf32>
    %41 = arith.maximumf %39, %40 : vector<64x128xf32>
    %c0_16 = arith.constant 0 : index
    %c0_17 = arith.constant 0 : index
    %42 = vector.load %arg4[%c0_16, %c0_17] : memref<128x128xf32, #tpu.memory_space<vmem>>, vector<128x128xf32>
    %cst_18 = arith.constant dense<0.000000e+00> : vector<64x128xf32>
    %43 = tpu.matmul %41, %42, %cst_18 {dimension_numbers = #tpu.dot_dimension_numbers<[1], [0], [0], [1], [0, 0, 1, 1], [], []>} : vector<64x128xf32>, vector<128x128xf32>, vector<64x128xf32> -> vector<64x128xf32>
    %c0_19 = arith.constant 0 : index
    %c0_20 = arith.constant 0 : index
    %44 = vector.load %arg5[%c0_19, %c0_20] : memref<1x128xf32, #tpu.memory_space<vmem>>, vector<1x128xf32>
    %45 = vector.broadcast %44 : vector<1x128xf32> to vector<64x128xf32>
    %46 = arith.addf %43, %45 : vector<64x128xf32>
    %47 = vector.extract_strided_slice %39 {offsets = [0, 0], sizes = [40, 128], strides = [1, 1]} : vector<64x128xf32> to vector<40x128xf32>
    %48 = vector.extract_strided_slice %46 {offsets = [0, 0], sizes = [40, 128], strides = [1, 1]} : vector<64x128xf32> to vector<40x128xf32>
    %49 = tpu.concatenate %47, %48 in 1 : vector<40x128xf32>, vector<40x128xf32> -> vector<40x256xf32>
    %c0_21 = arith.constant 0 : index
    %c0_22 = arith.constant 0 : index
    %50 = vector.load %arg6[%c0_21, %c0_22] : memref<40x256xf32, #tpu.memory_space<vmem>>, vector<40x256xf32>
    tpu.vector_store %arg6[%c0_21, %c0_22], %49 {strides = array<i32>} : memref<40x256xf32, #tpu.memory_space<vmem>>, vector<40x256xf32>,
    return
  }
}

</mosaic_0001>

<bundles_post_ra>
// kernel: forward.1
= control target key start
LH: loop header
LB: loop body
LE: loop exit
PB: predicated region body
PF: predicated region fallthrough
CT: control target
= control target key end

     0   :  { %11 = vsyncpa [#allocation3], 0  ;;  %s1139_s21 = smov [#allocation2]   ;;  %s1517_s0 = inlined_call_operand.vmem [shape: s32[2,128], index: 0, kind: input, shape index: {}]   ;;  %s1518_s1 = inlined_call_operand.vmem [shape: f32[64,64], index: 1, kind: input, shape index: {}]   ;;  %s1519_s2 = inlined_call_operand.hbm [shape: f32[64,128], index: 2, kind: input, shape index: {}]   ;;  %s1520_s3 = inlined_call_operand.vmem [shape: f32[1,128], index: 3, kind: input, shape index: {}]   ;;  %s1521_s4 = inlined_call_operand.vmem [shape: f32[128,128], index: 4, kind: input, shape index: {}]   ;;  %s1522_s5 = inlined_call_operand.vmem [shape: f32[1,128], index: 5, kind: input, shape index: {}]   ;;  %s1523_s6 = inlined_call_operand.vmem [shape: f32[40,256], index: 6, kind: output, shape index: {}]  }
   0x1   :  { %s21_s22 = sshll.u32 %s1139_s21, 4  ;;  %s1115_s25 = scalar_lea.hbm %s1519_s2, 1024  ;;  %s22_s22 = int_to_ptr.vmem [resolvable:$true] %s21_s22 }
   0x2   :  { %p1116_p0 = scmp.ne.s32.totalorder %s1519_s2, %s1115_s25  ;;  %p1119_p1 = scmp.lt.u32.totalorder %s1115_s25, %s1519_s2 }
   0x4   :  { %p1121_p2 = pnand %p1119_p1, %p1116_p0 }
   0x6   :  { %1124 = shalt.err (!%p1121_p2)
}
   0x7   :  { %s1125_s30 = scalar_lea.vmem %s22_s22, 1024  ;;  %p1130_p4 = scmp.lt.s32.totalorder %s22_s22, %s22_s22 }
   0x8   :  { %p1126_p3 = scmp.ne.s32.totalorder %s22_s22, %s1125_s30  ;;  %p1131_p5 = scmp.lt.s32.totalorder %s1125_s30, %s1125_s30 }
   0xa   :  { %p1132_p6 = por %p1131_p5, %p1130_p4 }
   0xc   :  { %p1133_p7 = pnand %p1132_p6, %p1126_p3 }
   0xe   :  { %1136 = shalt.err (!%p1133_p7)
}
   0xf   :  { %s1140_s7 = smov 128   ;;  %s1141_s8 = smov 8  }
  0x10   :  { %27 = dma.hbm_to_vmem [thread:$0]  %s1519_s2, 1024, %s22_s22, [#allocation3], %s1140_s7, %s1140_s7, %s1141_s8  }
  0x11   :  { %1137 = dma.done.wait [#allocation3], 1024  }
  0x12   :  { %1138 = vsyncadd [#allocation3], 4294966272  ;;  %v37_v0 = vlaneseq  ;;  %v754_v6 = vld [vmem:[%s1517_s0 + $0x1] ss:$0 sm:$0xff]  ;;  %v1213_v7 = vld [vmem:[%s1517_s0] ss:$0 sm:$0xff] }
  0x13   :  { %v300_v8 = vld [vmem:[#allocation2] sm:$0xff]  ;;  %v301_v9 = vld [vmem:[#allocation2 + $0x8] sm:$0xff]  ;;  %v302_v10 = vld [vmem:[#allocation2 + $0x10] sm:$0xff]  ;;  %v1142_v12 = vmov 1.0|1.0   ;;  %vm243_vm8 = vcmask 523264  }
  0x14   :  { %v1192_v1 = vshrl.u32 %v37_v0, 7  ;;  %v1194_v2 = vand.u32 127, %v37_v0  ;;  %v303_v11 = vld [vmem:[#allocation2 + $0x18] sm:$0xff]  ;;  %v1143_v16 = vmov 1.0   ;;  %v292_v17 = vld [vmem:[%s1518_s1] sm:$0xff]  ;;  %v1013_v18 = vpack.c.bf16 %v301_v9, %v300_v8  ;;  %v305_v21 = vld [vmem:[#allocation2 + $0x28] sm:$0xff] }
  0x15   :  { %v1017_v19 = vpack.c.bf16 %v303_v11, %v302_v10  ;;  %v304_v20 = vld [vmem:[#allocation2 + $0x20] sm:$0xff]  ;;  %913 = vmatprep.mubr.msk.f32.mxu1 %vm243_vm8, %v292_v17  ;;  %v306_v24 = vld [vmem:[#allocation2 + $0x30] sm:$0xff]  ;;  %v307_v25 = vld [vmem:[#allocation2 + $0x38] sm:$0xff]  ;;  %v1144_v36 = vmov 0.0  }
  0x16   :  { %v1197_v3 = vadd.s32 8, %v1192_v1  ;;  %v1200_v4 = vadd.s32 16, %v1192_v1  ;;  %v1203_v5 = vadd.s32 24, %v1192_v1  ;;  %vm80_vm1 = vcmp.eq.s32.totalorder %v1192_v1, %v754_v6  ;;  %1014 = vmatprep.subr.bf16.mxu1 %v1013_v18  ;;  %v293_v29 = vld [vmem:[%s1518_s1 + $0x8] sm:$0xff]  ;;  %v294_v30 = vld [vmem:[%s1518_s1 + $0x10] sm:$0xff]  ;;  %v295_v31 = vld [vmem:[%s1518_s1 + $0x18] sm:$0xff] }
  0x17   :  { %v1224_v14 = vadd.s32 32, %v1192_v1  ;;  %v1227_v15 = vadd.s32 40, %v1192_v1  ;;  %vm52_vm7 = vcmp.eq.s32.totalorder %v1192_v1, %v1213_v7  ;;  %1016 = vmatpush3.bf16.msra.mxu1 %v1013_v18  ;;  %v1021_v22 = vpack.c.bf16 %v305_v21, %v304_v20  ;;  %v296_v32 = vld [vmem:[%s1518_s1 + $0x20] sm:$0xff]  ;;  %v297_v33 = vld [vmem:[%s1518_s1 + $0x28] sm:$0xff]  ;;  %v298_v34 = vld [vmem:[%s1518_s1 + $0x30] sm:$0xff] }
  0x18   :  { %vm107_vm0 = vcmp.eq.s32.totalorder %v1197_v3, %v1194_v2  ;;  %vm81_vm2 = vcmp.eq.s32.totalorder %v1197_v3, %v754_v6  ;;  %vm82_vm3 = vcmp.eq.s32.totalorder %v1200_v4, %v754_v6  ;;  %vm83_vm4 = vcmp.eq.s32.totalorder %v1203_v5, %v754_v6  ;;  %885 = vmatprep.mubr.msk.f32.mxu0 %vm52_vm7, %v1143_v16  ;;  %v299_v35 = vld [vmem:[%s1518_s1 + $0x38] sm:$0xff]  ;;  %v606_v8 = vld [vmem:[%s1521_s4 + $0x8] sm:$0xff]  ;;  %v607_v9 = vld [vmem:[%s1521_s4 + $0x10] sm:$0xff] }
  0x19   :  { %vm997_vm5 = vmpackc.low %vm81_vm2, %vm80_vm1  ;;  %vm84_vm9 = vcmp.eq.s32.totalorder %v1224_v14, %v754_v6  ;;  %vm85_vm10 = vcmp.eq.s32.totalorder %v1227_v15, %v754_v6  ;;  %1018 = vmatprep.subr.bf16.mxu1 %v1017_v19  ;;  %v44_v26 = vadd.s32 48, %v1192_v1  ;;  %v45_v27 = vadd.s32 56, %v1192_v1  ;;  %v608_v11 = vld [vmem:[%s1521_s4 + $0x18] sm:$0xff]  ;;  %v609_v13 = vld [vmem:[%s1521_s4 + $0x20] sm:$0xff] }
  0x1a   :  { %998 = vmatprep.subr.msk.bf16.mxu0 %vm997_vm5, %v1142_v12  ;;  %vm1219_vm6 = vmpackc.low %vm83_vm4, %vm82_vm3  ;;  %v1025_v28 = vpack.c.bf16 %v307_v25, %v306_v24  ;;  %vm53_vm15 = vcmp.eq.s32.totalorder %v1197_v3, %v1213_v7  ;;  %vm54_vm1 = vcmp.eq.s32.totalorder %v1200_v4, %v1213_v7  ;;  %vm55_vm2 = vcmp.eq.s32.totalorder %v1203_v5, %v1213_v7  ;;  %v612_v17 = vld [vmem:[%s1521_s4 + $0x38] sm:$0xff]  ;;  %v614_v20 = vld [vmem:[%s1521_s4 + $0x48] sm:$0xff] }
  0x1b   :  { %1000 = vmatpush3.bf16.xpose.msk.msra.mxu0 %vm997_vm5, %v1142_v12  ;;  %vm1239_vm11 = vmpackc.low %vm85_vm10, %vm84_vm9  ;;  %1020 = vmatpush3.bf16.msra.mxu1 %v1017_v19  ;;  %vm86_vm12 = vcmp.eq.s32.totalorder %v44_v26, %v754_v6  ;;  %vm87_vm13 = vcmp.eq.s32.totalorder %v45_v27, %v754_v6  ;;  %vm56_vm3 = vcmp.eq.s32.totalorder %v1224_v14, %v1213_v7  ;;  %v131_v37 = vsel %vm107_vm0, 1.0, %v1144_v36  ;;  %v613_v19 = vld [vmem:[%s1521_s4 + $0x40] sm:$0xff]  ;;  %v616_v23 = vld [vmem:[%s1521_s4 + $0x58] sm:$0xff] }
  0x1c   :  { %1002 = vmatprep.subr.msk.bf16.mxu0 %vm1219_vm6, %v1142_v12  ;;  %1022 = vmatprep.subr.bf16.mxu1 %v1021_v22  ;;  %vm1009_vm14 = vmpackc.low %vm87_vm13, %vm86_vm12  ;;  %vm57_vm4 = vcmp.eq.s32.totalorder %v1227_v15, %v1213_v7  ;;  %vm58_vm5 = vcmp.eq.s32.totalorder %v44_v26, %v1213_v7  ;;  %vm106_vm7 = vcmp.eq.s32.totalorder %v1192_v1, %v1194_v2  ;;  %vm118_vm12 = vcmp.lt.s32.totalorder %v1224_v14, 34 }
  0x1d   :  { %v130_v38 = vsel %vm106_vm7, 1.0, %v1144_v36  ;;  %vm109_vm9 = vcmp.eq.s32.totalorder %v1203_v5, %v1194_v2  ;;  %vm108_vm10 = vcmp.eq.s32.totalorder %v1200_v4, %v1194_v2  ;;  %v1390_v21 = vpack.c.bf16 %v614_v20, %v613_v19 }
  0x1e   :  { %v133_v43 = vsel %vm109_vm9, 1.0, %v1144_v36  ;;  %v132_v44 = vsel %vm108_vm10, 1.0, %v1144_v36 }
  0x1f   :  { %1024 = vmatpush3.bf16.msra.mxu1 %v1021_v22  ;;  %v615_v22 = vld [vmem:[%s1521_s4 + $0x50] sm:$0xff] }
  0x20   :  { %1026 = vmatprep.subr.bf16.mxu1 %v1025_v28  ;;  %v1400_v24 = vpack.c.bf16 %v616_v23, %v615_v22 }
  0x23   :  { %1004 = vmatpush3.bf16.xpose.msk.msra.mxu0 %vm1219_vm6, %v1142_v12  ;;  %1028 = vmatpush3.bf16.msra.mxu1 %v1025_v28  ;;  %vm59_vm6 = vcmp.eq.s32.totalorder %v45_v27, %v1213_v7  ;;  %v605_v7 = vld [vmem:[%s1521_s4] sm:$0xff] }
  0x24   :  { %1006 = vmatprep.subr.msk.bf16.mxu0 %vm1239_vm11, %v1142_v12  ;;  %v1354_v10 = vpack.c.bf16 %v606_v8, %v605_v7 }
  0x26   :  { %914 = vmatmul.mubr.msk.f32.vlgmr.msra.gmra.mrb[0].mxu1 %vm243_vm8, %v293_v29 }
  0x27   :  { %916 = vmatprep.mubr.msk.f32.mxu1 %vm243_vm8, %v294_v30 }
  0x2a   :  { %917 = vmatmul.mubr.msk.f32.gmra.mrb[2].mxu1 %vm243_vm8, %v295_v31 }
  0x2b   :  { %1008 = vmatpush3.bf16.xpose.msk.msra.mxu0 %vm1239_vm11, %v1142_v12  ;;  %919 = vmatprep.mubr.msk.f32.mxu1 %vm243_vm8, %v296_v32  ;;  %vm110_vm11 = vcmp.eq.s32.totalorder %v1224_v14, %v1194_v2  ;;  %v610_v14 = vld [vmem:[%s1521_s4 + $0x28] sm:$0xff] }
  0x2c   :  { %1010 = vmatprep.subr.msk.bf16.mxu0 %vm1009_vm14, %v1142_v12  ;;  %vm126_vm0 = vmand %vm110_vm11, %vm118_vm12  ;;  %v1370_v15 = vpack.c.bf16 %v610_v14, %v609_v13 }
  0x2d   :  { %v134_v51 = vsel %vm126_vm0, 1.0, %v1144_v36 }
  0x2e   :  { %920 = vmatmul.mubr.msk.f32.gmra.mrb[4].mxu1 %vm243_vm8, %v297_v33 }
  0x2f   :  { %922 = vmatprep.mubr.msk.f32.mxu1 %vm243_vm8, %v298_v34 }
  0x32   :  { %923 = vmatmul.mubr.msk.f32.gmra.mrb[6].mxu1 %vm243_vm8, %v299_v35 }
  0x33   :  { %1012 = vmatpush3.bf16.xpose.msk.msra.mxu0 %vm1009_vm14, %v1142_v12  ;;  %v1359_v12 = vpack.c.bf16 %v608_v11, %v607_v9 }
  0x34   :  { %1046 = vmatprep.subr.bf16.mxu0 %v1354_v10 }
  0x3a   :  { %886 = vmatmul.mubr.msk.f32.vlgmr.msra.gmra.mrb[0].mxu0 %vm53_vm15, %v1143_v16 }
  0x3b   :  { %888 = vmatprep.mubr.msk.f32.mxu0 %vm54_vm1, %v1143_v16  ;;  %1048 = vmatpush3.bf16.msra.mxu0 %v1354_v10 }
  0x3c   :  { %1050 = vmatprep.subr.bf16.mxu0 %v1359_v12 }
  0x3e   :  { %889 = vmatmul.mubr.msk.f32.gmra.mrb[2].mxu0 %vm55_vm2, %v1143_v16 }
  0x3f   :  { %891 = vmatprep.mubr.msk.f32.mxu0 %vm56_vm3, %v1143_v16  ;;  %1052 = vmatpush3.bf16.msra.mxu0 %v1359_v12 }
  0x40   :  { %1054 = vmatprep.subr.bf16.mxu0 %v1370_v15 }
  0x42   :  { %892 = vmatmul.mubr.msk.f32.gmra.mrb[4].mxu0 %vm57_vm4, %v1143_v16 }
  0x43   :  { %894 = vmatprep.mubr.msk.f32.mxu0 %vm58_vm5, %v1143_v16  ;;  %1056 = vmatpush3.bf16.msra.mxu0 %v1370_v15 }
  0x46   :  { %895 = vmatmul.mubr.msk.f32.gmra.mrb[6].mxu0 %vm59_vm6, %v1143_v16  ;;  %v611_v16 = vld [vmem:[%s1521_s4 + $0x30] sm:$0xff] }
  0x47   :  { %v1380_v18 = vpack.c.bf16 %v612_v17, %v611_v16 }
  0x49   :  { %1058 = vmatprep.subr.bf16.mxu0 %v1380_v18 }
  0x4a   :  { %1060 = vmatpush3.bf16.msra.mxu0 %v1380_v18 }
  0x4b   :  { %1062 = vmatprep.subr.bf16.mxu0 %v1390_v21 }
  0x4e   :  { %1064 = vmatpush3.bf16.msra.mxu0 %v1390_v21 }
  0x4f   :  { %1066 = vmatprep.subr.bf16.mxu0 %v1400_v24 }
  0x52   :  { %1068 = vmatpush3.bf16.msra.mxu0 %v1400_v24 }
  0xf9   :  { %v915_v63 = vpop.f32.mrb[0].mxu1 }
  0xfa   :  { %v398_v0 = vpop.f32.mrb[1].mxu1 }
  0xfd   :  { %v1333_v1 = vpop.f32.mrb[2].mxu1 }
  0xfe   :  { %v1335_v2 = vpop.f32.mrb[3].mxu1 }
 0x101   :  { %v1337_v3 = vpop.f32.mrb[4].mxu1 }
 0x102   :  { %v1339_v4 = vpop.f32.mrb[5].mxu1 }
 0x105   :  { %v1341_v5 = vpop.f32.mrb[6].mxu1 }
 0x106   :  { %v1343_v6 = vpop.f32.mrb[7].mxu1 }
 0x10d   :  { %v887_v39 = vpop.f32.mrb[0].mxu0 }
 0x10e   :  { %v1300_v40 = vadd.f32 %v887_v39, %v131_v37  ;;  %v204_v41 = vpop.f32.mrb[1].mxu0 }
 0x10f   :  { %v205_v42 = vadd.f32 %v204_v41, %v130_v38 }
 0x110   :  { %v247_v53 = vsel %vm243_vm8, %v1300_v40, 0.0 }
 0x111   :  { %v890_v45 = vpop.f32.mrb[2].mxu0  ;;  %941 = vmatprep.mubr.msk.f32.mxu1 %vm243_vm8, %v205_v42  ;;  %v244_v46 = vsel %vm243_vm8, %v205_v42, 0.0 }
 0x112   :  { %v1307_v47 = vadd.f32 %v890_v45, %v133_v43  ;;  %v214_v48 = vpop.f32.mrb[3].mxu0  ;;  %245 = vadd.xlane.f32.xlu0 %v244_v46 }
 0x113   :  { %v1309_v49 = vadd.f32 %v214_v48, %v132_v44 }
 0x114   :  { %v253_v50 = vsel %vm243_vm8, %v1307_v47, 0.0 }
 0x115   :  { %254 = vadd.xlane.f32.xlu1 %v253_v50  ;;  %v1313_v52 = vpop.f32.mrb[4].mxu0  ;;  %v250_v56 = vsel %vm243_vm8, %v1309_v49, 0.0 }
 0x116   :  { %v224_v54 = vpop.f32.mrb[5].mxu0  ;;  %248 = vadd.xlane.f32.xlu0 %v247_v53  ;;  %v259_v61 = vsel %vm243_vm8, %v1313_v52, 0.0 }
 0x117   :  { %v1317_v55 = vadd.f32 %v224_v54, %v134_v51 }
 0x119   :  { %251 = vadd.xlane.f32.xlu1 %v250_v56  ;;  %v256_v57 = vsel %vm243_vm8, %v1317_v55, 0.0  ;;  %v1323_v58 = vpop.f32.mrb[6].mxu0 }
 0x11a   :  { %257 = vadd.xlane.f32.xlu0 %v256_v57  ;;  %v1325_v59 = vpop.f32.mrb[7].mxu0  ;;  %v265_v62 = vsel %vm243_vm8, %v1323_v58, 0.0 }
 0x11b   :  { %v262_v60 = vsel %vm243_vm8, %v1325_v59, 0.0 }
 0x11d   :  { %260 = vadd.xlane.f32.xlu1 %v259_v61 }
 0x11e   :  { %263 = vadd.xlane.f32.xlu0 %v262_v60 }
 0x121   :  { %266 = vadd.xlane.f32.xlu1 %v265_v62 }
 0x19f   :  { %v246_v25 = vpop.xlane.xlu0 %245 }
 0x1a0   :  { %1099 = vrsqrt.f32 %v246_v25  ;;  %vm268_vm13 = vcmp.gt.f32.partialorder %v246_v25, 0.0 }
 0x1a2   :  { %v255_v26 = vpop.xlane.xlu1 %254 }
 0x1a3   :  { %1101 = vrsqrt.f32 %v255_v26  ;;  %v249_v27 = vpop.xlane.xlu0 %248  ;;  %vm271_vm15 = vcmp.gt.f32.partialorder %v255_v26, 0.0 }
 0x1a4   :  { %1103 = vrsqrt.f32 %v249_v27  ;;  %vm269_vm14 = vcmp.gt.f32.partialorder %v249_v27, 0.0 }
 0x1a6   :  { %v252_v28 = vpop.xlane.xlu1 %251 }
 0x1a7   :  { %1105 = vrsqrt.f32 %v252_v28  ;;  %v258_v29 = vpop.xlane.xlu0 %257  ;;  %vm270_vm1 = vcmp.gt.f32.partialorder %v252_v28, 0.0 }
 0x1a8   :  { %1107 = vrsqrt.f32 %v258_v29  ;;  %vm272_vm2 = vcmp.gt.f32.partialorder %v258_v29, 0.0 }
 0x1aa   :  { %v1100_v30 = vpop.eup %1099  ;;  %v261_v31 = vpop.xlane.xlu1 %260 }
 0x1ab   :  { %1109 = vrsqrt.f32 %v261_v31  ;;  %v264_v32 = vpop.xlane.xlu0 %263  ;;  %v1405_v34 = vsel %vm268_vm13, %v1100_v30, 0.0  ;;  %vm273_vm3 = vcmp.gt.f32.partialorder %v261_v31, 0.0 }
 0x1ac   :  { %1111 = vrsqrt.f32 %v264_v32  ;;  %v437_v39 = vmul.f32 %v398_v0, %v1405_v34  ;;  %vm274_vm4 = vcmp.gt.f32.partialorder %v264_v32, 0.0 }
 0x1ad   :  { %v1102_v33 = vpop.eup %1101 }
 0x1ae   :  { %v1104_v35 = vpop.eup %1103  ;;  %v267_v36 = vpop.xlane.xlu1 %266  ;;  %v1411_v41 = vsel %vm271_vm15, %v1102_v33, 0.0 }
 0x1af   :  { %v1407_v37 = vsel %vm269_vm14, %v1104_v35, 0.0  ;;  %1113 = vrsqrt.f32 %v267_v36  ;;  %v440_v46 = vmul.f32 %v1333_v1, %v1411_v41  ;;  %vm275_vm5 = vcmp.gt.f32.partialorder %v267_v36, 0.0  ;;  %v796_v36 = vld [vmem:[%s1522_s5] ss:$0 sm:$0xff] }
 0x1b0   :  { %v438_v38 = vmul.f32 %v915_v63, %v1407_v37 }
 0x1b1   :  { %v1106_v42 = vpop.eup %1105 }
 0x1b2   :  { %v1108_v43 = vpop.eup %1107  ;;  %v1029_v44 = vpack.c.bf16 %v438_v38, %v437_v39  ;;  %v1413_v45 = vsel %vm270_vm1, %v1106_v42, 0.0 }
 0x1b3   :  { %v439_v48 = vmul.f32 %v1335_v2, %v1413_v45  ;;  %v1419_v50 = vsel %vm272_vm2, %v1108_v43, 0.0 }
 0x1b4   :  { %1030 = vmatprep.subr.bf16.mxu1 %v1029_v44  ;;  %v441_v60 = vmul.f32 %v1339_v4, %v1419_v50  ;;  %v795_v4 = vld [vmem:[%s1520_s3] ss:$0 sm:$0xff] }
 0x1b5   :  { %v1110_v51 = vpop.eup %1109  ;;  %v1033_v53 = vpack.c.bf16 %v440_v46, %v439_v48  ;;  %1032 = vmatpush3.bf16.msra.mxu1 %v1029_v44 }
 0x1b6   :  { %v1112_v54 = vpop.eup %1111  ;;  %v1421_v56 = vsel %vm273_vm3, %v1110_v51, 0.0 }
 0x1b7   :  { %v442_v57 = vmul.f32 %v1337_v3, %v1421_v56  ;;  %1034 = vmatprep.subr.bf16.mxu1 %v1033_v53  ;;  %v1427_v61 = vsel %vm274_vm4, %v1112_v54, 0.0 }
 0x1b8   :  { %v443_v2 = vmul.f32 %v1343_v6, %v1427_v61 }
 0x1b9   :  { %v1114_v62 = vpop.eup %1113  ;;  %v1037_v63 = vpack.c.bf16 %v442_v57, %v441_v60  ;;  %1036 = vmatpush3.bf16.msra.mxu1 %v1033_v53 }
 0x1ba   :  { %v1429_v0 = vsel %vm275_vm5, %v1114_v62, 0.0 }
 0x1bb   :  { %v444_v1 = vmul.f32 %v1341_v5, %v1429_v0  ;;  %1038 = vmatprep.subr.bf16.mxu1 %v1037_v63 }
 0x1bd   :  { %v1041_v3 = vpack.c.bf16 %v444_v1, %v443_v2  ;;  %1040 = vmatpush3.bf16.msra.mxu1 %v1037_v63 }
 0x1bf   :  { %1042 = vmatprep.subr.bf16.mxu1 %v1041_v3 }
 0x1c1   :  { %1044 = vmatpush3.bf16.msra.mxu1 %v1041_v3 }
 0x1c2   :  { %1077 = vmatprep.subr.bf16.mxu1 %v1354_v10 }
 0x1c4   :  { %942 = vmatmul.mubr.msk.f32.vlgmr.msra.gmra.mrb[8].mxu1 %vm243_vm8, %v1300_v40  ;;  %v617_v40 = vld [vmem:[%s1521_s4 + $0x60] sm:$0xff] }
 0x1c5   :  { %944 = vmatprep.mubr.msk.f32.mxu1 %vm243_vm8, %v1309_v49  ;;  %1085 = vmatpush3.bf16.msra.mxu1 %v1354_v10 }
 0x1c6   :  { %1078 = vmatprep.subr.bf16.mxu1 %v1359_v12 }
 0x1c8   :  { %945 = vmatmul.mubr.msk.f32.gmra.mrb[10].mxu1 %vm243_vm8, %v1307_v47  ;;  %v618_v47 = vld [vmem:[%s1521_s4 + $0x68] sm:$0xff] }
 0x1c9   :  { %947 = vmatprep.mubr.msk.f32.mxu1 %vm243_vm8, %v1317_v55  ;;  %1086 = vmatpush3.bf16.msra.mxu1 %v1359_v12  ;;  %v1069_v49 = vpack.c.bf16 %v618_v47, %v617_v40  ;;  %v620_v55 = vld [vmem:[%s1521_s4 + $0x78] sm:$0xff] }
 0x1ca   :  { %1079 = vmatprep.subr.bf16.mxu1 %v1370_v15 }
 0x1cb   :  { %1070 = vmatprep.subr.bf16.mxu0 %v1069_v49 }
 0x1cc   :  { %948 = vmatmul.mubr.msk.f32.gmra.mrb[12].mxu1 %vm243_vm8, %v1313_v52  ;;  %1072 = vmatpush3.bf16.msra.mxu0 %v1069_v49  ;;  %v619_v52 = vld [vmem:[%s1521_s4 + $0x70] sm:$0xff] }
 0x1cd   :  { %950 = vmatprep.mubr.msk.f32.mxu1 %vm243_vm8, %v1325_v59  ;;  %1087 = vmatpush3.bf16.msra.mxu1 %v1370_v15 }
 0x1ce   :  { %1080 = vmatprep.subr.bf16.mxu1 %v1380_v18 }
 0x1d0   :  { %951 = vmatmul.mubr.msk.f32.gmra.mrb[14].mxu1 %vm243_vm8, %v1323_v58  ;;  %v1073_v58 = vpack.c.bf16 %v620_v55, %v619_v52 }
 0x1d1   :  { %1088 = vmatpush3.bf16.msra.mxu1 %v1380_v18 }
 0x1d2   :  { %1081 = vmatprep.subr.bf16.mxu1 %v1390_v21  ;;  %1074 = vmatprep.subr.bf16.mxu0 %v1073_v58 }
 0x1d3   :  { %1076 = vmatpush3.bf16.msra.mxu0 %v1073_v58 }
 0x1d5   :  { %1089 = vmatpush3.bf16.msra.mxu1 %v1390_v21 }
 0x1d6   :  { %1082 = vmatprep.subr.bf16.mxu1 %v1400_v24 }
 0x1d9   :  { %1090 = vmatpush3.bf16.msra.mxu1 %v1400_v24 }
 0x1da   :  { %1083 = vmatprep.subr.bf16.mxu1 %v1069_v49 }
 0x1dd   :  { %1091 = vmatpush3.bf16.msra.mxu1 %v1069_v49 }
 0x1de   :  { %1084 = vmatprep.subr.bf16.mxu1 %v1073_v58 }
 0x1e1   :  { %1092 = vmatpush3.bf16.msra.mxu1 %v1073_v58 }
 0x297   :  { %v943_v59 = vpop.f32.mrb[8].mxu1 }
 0x298   :  { %v575_v5 = vmul.f32 %v943_v59, %v1407_v37  ;;  %v535_v6 = vpop.f32.mrb[9].mxu1 }
 0x299   :  { %v574_v7 = vmul.f32 %v535_v6, %v1405_v34 }
 0x29a   :  { %v590_v8 = vadd.f32 %v795_v4, %v575_v5 }
 0x29b   :  { %v589_v9 = vadd.f32 %v795_v4, %v574_v7  ;;  %v946_v10 = vpop.f32.mrb[10].mxu1 }
 0x29c   :  { %732 = vst [vmem:[%s1523_s6 + $0x10] sm:$0xff] %v590_v8  ;;  %v577_v11 = vmul.f32 %v946_v10, %v1411_v41  ;;  %v545_v12 = vpop.f32.mrb[11].mxu1  ;;  %v598_v15 = vmax.f32 %v590_v8, 0.0 }
 0x29d   :  { %730 = vst [vmem:[%s1523_s6] sm:$0xff] %v589_v9  ;;  %v576_v13 = vmul.f32 %v545_v12, %v1413_v45  ;;  %v597_v14 = vmax.f32 %v589_v9, 0.0 }
 0x29e   :  { %v592_v16 = vadd.f32 %v795_v4, %v577_v11 }
 0x29f   :  { %v591_v17 = vadd.f32 %v795_v4, %v576_v13  ;;  %v949_v18 = vpop.f32.mrb[12].mxu1  ;;  %985 = vmatprep.mubr.f32.mxu0 %v597_v14 }
 0x2a0   :  { %736 = vst [vmem:[%s1523_s6 + $0x30] sm:$0xff] %v592_v16  ;;  %v579_v19 = vmul.f32 %v949_v18, %v1421_v56  ;;  %v555_v20 = vpop.f32.mrb[13].mxu1  ;;  %986 = vmatmul.mubr.f32.vlgmr.msra.gmra.mrb[8].mxu0 %v598_v15  ;;  %v600_v24 = vmax.f32 %v592_v16, 0.0 }
 0x2a1   :  { %734 = vst [vmem:[%s1523_s6 + $0x20] sm:$0xff] %v591_v17  ;;  %v578_v21 = vmul.f32 %v555_v20, %v1419_v50  ;;  %v599_v22 = vmax.f32 %v591_v17, 0.0 }
 0x2a2   :  { %v594_v23 = vadd.f32 %v795_v4, %v579_v19 }
 0x2a3   :  { %v593_v25 = vadd.f32 %v795_v4, %v578_v21  ;;  %v952_v26 = vpop.f32.mrb[14].mxu1  ;;  %988 = vmatprep.mubr.f32.mxu0 %v599_v22 }
 0x2a4   :  { %v581_v27 = vmul.f32 %v952_v26, %v1429_v0  ;;  %v565_v28 = vpop.f32.mrb[15].mxu1  ;;  %989 = vmatmul.mubr.f32.gmra.mrb[10].mxu0 %v600_v24  ;;  %v602_v31 = vmax.f32 %v594_v23, 0.0 }
 0x2a5   :  { %738 = vst [vmem:[%s1523_s6 + $0x40] sm:$0xff] %v593_v25  ;;  %v580_v29 = vmul.f32 %v565_v28, %v1427_v61  ;;  %v601_v30 = vmax.f32 %v593_v25, 0.0 }
 0x2a6   :  { %v596_v32 = vadd.f32 %v795_v4, %v581_v27 }
 0x2a7   :  { %v595_v33 = vadd.f32 %v795_v4, %v580_v29  ;;  %991 = vmatprep.mubr.f32.mxu1 %v601_v30 }
 0x2a8   :  { %992 = vmatmul.mubr.f32.vlgmr.msra.gmra.mrb[16].mxu1 %v602_v31  ;;  %v604_v35 = vmax.f32 %v596_v32, 0.0 }
 0x2a9   :  { %v603_v34 = vmax.f32 %v595_v33, 0.0 }
 0x2ab   :  { %994 = vmatprep.mubr.f32.mxu1 %v603_v34 }
 0x2ac   :  { %995 = vmatmul.mubr.f32.gmra.mrb[18].mxu1 %v604_v35 }
 0x373   :  { %v987_v37 = vpop.f32.mrb[8].mxu0 }
 0x374   :  { %v700_v38 = vadd.f32 %v987_v37, %v796_v36  ;;  %v694_v39 = vpop.f32.mrb[9].mxu0 }
 0x375   :  { %v695_v41 = vadd.f32 %v796_v36, %v694_v39 }
 0x376   :  { %733 = vst [vmem:[%s1523_s6 + $0x18] sm:$0xff] %v700_v38 }
 0x377   :  { %731 = vst [vmem:[%s1523_s6 + $0x8] sm:$0xff] %v695_v41  ;;  %v990_v42 = vpop.f32.mrb[10].mxu0 }
 0x378   :  { %v710_v43 = vadd.f32 %v990_v42, %v796_v36  ;;  %v704_v44 = vpop.f32.mrb[11].mxu0 }
 0x379   :  { %v705_v45 = vadd.f32 %v796_v36, %v704_v44 }
 0x37a   :  { %737 = vst [vmem:[%s1523_s6 + $0x38] sm:$0xff] %v710_v43 }
 0x37b   :  { %735 = vst [vmem:[%s1523_s6 + $0x28] sm:$0xff] %v705_v45  ;;  %v993_v46 = vpop.f32.mrb[16].mxu1 }
 0x37c   :  { %v714_v48 = vpop.f32.mrb[17].mxu1 }
 0x37d   :  { %v715_v50 = vadd.f32 %v796_v36, %v714_v48 }
 0x37f   :  { %739 = vst [vmem:[%s1523_s6 + $0x48] sm:$0xff] %v715_v50  ;;  %v996_v51 = vpop.f32.mrb[18].mxu1 }
 0x380   :  { %v723_v53 = vpop.f32.mrb[19].mxu1 }
 0x381   :  { %744 = vsyncpa [#allocation3], 1 }

</bundles_post_ra>
